<compile_context>
chip_gen: v7x
topology: tpu7x:2x2x1
jax: 0.10.0
libtpu: 0.0.40
codegen_flags: <defaults>
</compile_context>

<pallas_src>
import functools

import jax
import jax.numpy as jnp
from jax.experimental import pallas as pl
from jax.experimental.pallas import tpu as pltpu


LANE = 128


def _round_up(x, m):
    return ((x + m - 1) // m) * m


def _wordavg_attention_kernel(ids_ref, stats_ref, bias_ref, out_ref, *,
                              tb, seq, out_dim):
    """One batch tile of TB rows.

    ids_ref   : [TB, S]      int32  token ids                 (streamed)
    stats_ref : [V_PAD, 128] bf16   per-vocab stats            (resident, 1 buffer)
                 cols [0:O) = table[v] @ W^T
                 col  O     = table[v] . coef
                 col  O+1   = ||table[v]|| * ||coef||
    bias_ref  : [1, 128]     f32    linear bias (lane padded)  (resident, 1 buffer)
    out_ref   : [TB, 128]    f32    lane-padded output block
    """
    vocab = stats_ref.shape[0]
    lane = stats_ref.shape[1]
    eps = jnp.float32(1e-8)

    ids = ids_ref[...]                                            # [TB, S]
    stats = stats_ref[...]                                        # [V_PAD, 128] bf16
    pos = jax.lax.broadcasted_iota(jnp.int32, (tb, vocab), 1)     # [TB, V_PAD]
    lane_s = jax.lax.broadcasted_iota(jnp.int32, (tb, seq), 1)    # [TB, S]

    # ---- fused embedding+linear gather: one bf16 MXU pass per sequence pos.
    # Everything stays 2-D; S is small for this model so a static unroll is fine.
    # TODO(synk): for long sequences fold the S loop into a single
    # [TB*S, V_PAD] matmul (or a fori_loop) instead of a static unroll.
    gathered = []
    scores = jnp.zeros((tb, seq), jnp.float32)
    for s in range(seq):
        # bool -> f32 -> bf16 (bool->f32 convert is the well-supported path).
        onehot = (ids[:, s:s + 1] == pos).astype(jnp.float32).astype(jnp.bfloat16)
        g = jnp.dot(onehot, stats,
                    preferred_element_type=jnp.float32)           # [TB, 128] f32
        gathered.append(g)
        # cosine_similarity(embed, coef) = dots / max(||q||*||k||, eps)
        # (torch-docs formula: eps clamps the PRODUCT of the norms).
        # Exact divide here for accuracy; approx recip only for the softmax.
        dots = g[:, out_dim:out_dim + 1]                          # [TB, 1]
        qk = g[:, out_dim + 1:out_dim + 2]                        # [TB, 1]
        sc = dots / jnp.maximum(qk, eps)                          # [TB, 1]
        scores = jnp.where(lane_s == s, sc, scores)               # place into lane s

    # NOTE: the reference calls scores.masked_fill(mask == 0, -1e9) WITHOUT
    # assigning the result (non-in-place), so the mask is a semantic no-op.
    # Reproduced exactly: no masking applied.

    # ---- softmax over the sequence axis (EUP approx recip for the denom) ---
    m = jnp.max(scores, axis=-1, keepdims=True)
    e = jnp.exp(scores - m)
    p = e * pl.reciprocal(jnp.sum(e, axis=-1, keepdims=True), approx=True)

    # ---- attention-weighted sum of the already-projected rows + bias -------
    # Lanes >= O carry junk (weighted dots/norms); the wrapper slices them off.
    acc = jnp.zeros((tb, lane), jnp.float32)
    for s in range(seq):
        acc = acc + p[:, s:s + 1] * gathered[s]
    out_ref[...] = acc + bias_ref[...]


def wordavg_attention_forward(x, mask, emb_table, coef, lin_w, lin_b):
    """x: [B,S] int token ids; mask: [B,S] (unused - the reference's
    masked_fill is not in-place so it has no effect); emb_table: [V,E];
    coef: [E]; lin_w: [O,E]; lin_b: [O]."""
    del mask  # non-in-place masked_fill in the reference => no effect

    B, S = x.shape
    V, E = emb_table.shape
    O = lin_w.shape[0]

    if O + 2 > LANE:
        # TODO(synk): for very wide output layers use a second stats slab or
        # fall back to a raw-embedding gather; not needed for this model.
        raise NotImplementedError("output_size must be <= 126 for the fused stats path")
    V_PAD = _round_up(V, LANE)
    # TODO(synk): above V of a few thousand, replace the one-hot MXU gather
    # with a DMA row-gather (stats in memory_space=pl.ANY + scalar-prefetch ids).

    # ---- per-vocab stats precompute (exact f32, cast to bf16 once) ---------
    table_f = emb_table.astype(jnp.float32)
    coef_f = coef.astype(jnp.float32)
    w_f = lin_w.astype(jnp.float32)
    proj_v = table_f @ w_f.T                                     # [V, O]
    dots_v = table_f @ coef_f                                    # [V]
    qk_v = jnp.sqrt(jnp.sum(table_f * table_f, axis=-1)) * jnp.sqrt(
        jnp.sum(coef_f * coef_f))                                # [V]
    stats = jnp.zeros((V_PAD, LANE), jnp.float32)
    stats = stats.at[:V, :O].set(proj_v)
    stats = stats.at[:V, O].set(dots_v)
    stats = stats.at[:V, O + 1].set(qk_v)
    stats = stats.astype(jnp.bfloat16)                           # bf16 MXU operand
    bias_p = jnp.zeros((1, LANE), jnp.float32).at[0, :O].set(
        lin_b.astype(jnp.float32))

    # ---- per-generation VMEM budget ----------------------------------------
    try:
        vmem_physical = int(pltpu.get_tpu_info().vmem_capacity_bytes)
    except Exception:
        vmem_physical = 64 * 1024 * 1024      # conservative (v7x per-core)
    if vmem_physical <= 0:
        vmem_physical = 64 * 1024 * 1024
    vmem_limit = min(vmem_physical * 3 // 4, 96 * 1024 * 1024)   # 48 MiB on v7x
    budget = vmem_limit // 2                  # leave DMA / scratch headroom

    # ---- batch tile selection ----------------------------------------------
    resident = V_PAD * LANE * 2 + LANE * 4            # single-buffered stats + bias
    per_row = (2 * _round_up(S, LANE) * 4             # ids block (lane-padded, 2 bufs)
               + 2 * LANE * 4                         # output block (2 bufs)
               + (S + 4) * LANE * 4                   # gathered rows + p/scores live
               + V_PAD * 2)                           # bf16 one-hot intermediate
    tb_cap = max(8, ((budget - resident) // max(per_row, 1)) // 8 * 8)
    tb_half = max(8, (_round_up(B, 16) // 2) // 8 * 8)  # guarantees >= 2 grid steps
    TB = min(512, tb_cap, tb_half)
    G = max(2, pl.cdiv(B, TB))                 # never a length-1 grid (v7x megacore)
    if G % 2:
        G += 1                                 # even step count balances the 2 cores
    B_pad = G * TB

    ids = x.astype(jnp.int32)
    if B_pad != B:
        ids = jnp.pad(ids, ((0, B_pad - B), (0, 0)))  # padded rows -> token 0

    kernel = functools.partial(_wordavg_attention_kernel, tb=TB, seq=S, out_dim=O)

    # Rough cost hint for the XLA scheduler (gather matmuls dominate).
    tokens = B_pad * S
    flops = int(tokens * 2 * V_PAD * LANE + tokens * 8 * LANE)
    transcendentals = int(tokens + 2 * B_pad)
    bytes_accessed = int(4 * ids.size + 2 * stats.size + 4 * bias_p.size
                         + 4 * B_pad * LANE)

    out = pl.pallas_call(
        kernel,
        out_shape=jax.ShapeDtypeStruct((B_pad, LANE), jnp.float32),
        grid=(G,),
        in_specs=[
            pl.BlockSpec((TB, S), lambda b: (b, 0)),             # ids (streamed)
            pl.BlockSpec(memory_space=pltpu.MemorySpace.VMEM),   # stats (resident, single buffer)
            pl.BlockSpec(memory_space=pltpu.MemorySpace.VMEM),   # bias  (resident, single buffer)
        ],
        out_specs=pl.BlockSpec((TB, LANE), lambda b: (b, 0)),    # lane-dense stores
        compiler_params=pltpu.CompilerParams(
            dimension_semantics=("parallel",),   # shard batch tiles across v7x cores
            vmem_limit_bytes=vmem_limit,
        ),
        cost_estimate=pl.CostEstimate(flops=flops,
                                      transcendentals=transcendentals,
                                      bytes_accessed=bytes_accessed),
    )(ids, stats, bias_p)

    return jnp.squeeze(out[:B, :O])   # matches `.squeeze()` in the PyTorch forward


def _reference_forward(x, emb_table, coef, lin_w, lin_b):
    """Pure-JAX mirror of the PyTorch forward (sanity check)."""
    embed = emb_table[x]                                          # [B, S, E]
    dots = jnp.einsum("bse,e->bs", embed, coef)
    q_norm = jnp.sqrt(jnp.sum(embed * embed, axis=-1))
    k_norm = jnp.sqrt(jnp.sum(coef * coef))
    scores = dots / jnp.maximum(q_norm * k_norm, 1e-8)
    p = jax.nn.softmax(scores, axis=-1)
    ctx = jnp.einsum("bs,bse->be", p, embed)
    return jnp.squeeze(ctx @ lin_w.T + lin_b)


if __name__ == "__main__":
    # Small, module-consistent shapes.
    vocab_size = 50
    embedding_size = 32
    output_size = 1
    pad_idx = 0
    batch, seq_len = 2, 8

    key = jax.random.PRNGKey(0)
    k_tok, k_emb, k_coef, k_lin = jax.random.split(key, 4)

    # Deterministic parameter init mirroring init_weights():
    #   embeddings.weight ~ U(-0.1, 0.1), coef ~ N(0,1),
    #   linear.weight ~ U(-0.1, 0.1), linear.bias = 0.
    emb_table = jax.random.uniform(
        k_emb, (vocab_size, embedding_size), jnp.float32, -0.1, 0.1)
    coef = jax.random.normal(k_coef, (embedding_size,), jnp.float32)
    lin_w = jax.random.uniform(
        k_lin, (output_size, embedding_size), jnp.float32, -0.1, 0.1)
    lin_b = jnp.zeros((output_size,), jnp.float32)

    # Inputs: token ids and a padding mask (mask==0 at padded positions).
    x = jax.random.randint(k_tok, (batch, seq_len), 1, vocab_size, jnp.int32)
    x = x.at[:, -2:].set(pad_idx)
    mask = (x != pad_idx).astype(jnp.int32)

    out = wordavg_attention_forward(x, mask, emb_table, coef, lin_w, lin_b)
    out = jax.block_until_ready(out)

    # Loose tolerance: bf16 stats + approx softmax reciprocal vs f32 reference.
    ref = _reference_forward(x, emb_table, coef, lin_w, lin_b)
    if not bool(jnp.allclose(out, ref, atol=5e-3, rtol=5e-2)):
        raise AssertionError(f"kernel vs reference mismatch: {out} vs {ref}")

    # Dropout is defined in __init__ but never used in forward(); nothing to do.
    print("KERNEL_OK")
</pallas_src>

<mosaic_0001>
module attributes {stable_mosaic.version = 11 : i64} {
  func.func @_wordavg_attention_kernel(%arg0: i32, %arg1: memref<8x8xi32, #tpu.memory_space<vmem>>, %arg2: memref<128x128xbf16, #tpu.memory_space<vmem>>, %arg3: memref<1x128xf32, #tpu.memory_space<vmem>>, %arg4: memref<8x128xf32, #tpu.memory_space<vmem>>) attributes {dimension_semantics = [#tpu.dimension_semantics<parallel>], iteration_bounds = array<i64: 2>, scalar_prefetch = 0 : i64, scratch_operands = 0 : i64, tpu.core_type = #tpu.core_type<tc>, window_params = [{transform_indices = @transform_0, window_bounds = array<i64: 8, 8>}, {pipeline_mode = #tpu.pipeline_mode<synchronous>, transform_indices = @transform_1, window_bounds = array<i64: 128, 128>}, {pipeline_mode = #tpu.pipeline_mode<synchronous>, transform_indices = @transform_2, window_bounds = array<i64: 1, 128>}, {transform_indices = @transform_3, window_bounds = array<i64: 8, 128>}]} {
    %c0 = arith.constant 0 : index
    %c0_0 = arith.constant 0 : index
    %0 = vector.load %arg1[%c0, %c0_0] : memref<8x8xi32, #tpu.memory_space<vmem>>, vector<8x8xi32>
    %c0_1 = arith.constant 0 : index
    %c0_2 = arith.constant 0 : index
    %1 = vector.load %arg2[%c0_1, %c0_2] : memref<128x128xbf16, #tpu.memory_space<vmem>>, vector<128x128xbf16>
    %2 = tpu.iota {dimensions = array<i32: 1>} : vector<8x128xi32>
    %3 = tpu.iota {dimensions = array<i32: 1>} : vector<8x8xi32>
    %cst = arith.constant 0.000000e+00 : f32
    %4 = vector.broadcast %cst : f32 to vector<8x8xf32>
    %5 = vector.extract_strided_slice %0 {offsets = [0, 0], sizes = [8, 1], strides = [1, 1]} : vector<8x8xi32> to vector<8x1xi32>
    %6 = vector.broadcast %5 : vector<8x1xi32> to vector<8x128xi32>
    %7 = arith.cmpi eq, %6, %2 : vector<8x128xi32>
    %8 = arith.extui %7 : vector<8x128xi1> to vector<8x128xi32>
    %9 = arith.sitofp %8 : vector<8x128xi32> to vector<8x128xf32>
    %10 = arith.truncf %9 : vector<8x128xf32> to vector<8x128xbf16>
    %cst_3 = arith.constant dense<0.000000e+00> : vector<8x128xf32>
    %11 = tpu.matmul %10, %1, %cst_3 {dimension_numbers = #tpu.dot_dimension_numbers<[1], [0], [0], [1], [0, 0, 1, 1], [], []>} : vector<8x128xbf16>, vector<128x128xbf16>, vector<8x128xf32> -> vector<8x128xf32>
    %12 = vector.extract_strided_slice %11 {offsets = [0, 1], sizes = [8, 1], strides = [1, 1]} : vector<8x128xf32> to vector<8x1xf32>
    %13 = vector.extract_strided_slice %11 {offsets = [0, 2], sizes = [8, 1], strides = [1, 1]} : vector<8x128xf32> to vector<8x1xf32>
    %cst_4 = arith.constant 9.99999993E-9 : f32
    %14 = vector.broadcast %cst_4 : f32 to vector<8x1xf32>
    %15 = arith.maximumf %13, %14 : vector<8x1xf32>
    %16 = arith.divf %12, %15 : vector<8x1xf32>
    %c0_i32 = arith.constant 0 : i32
    %17 = vector.broadcast %c0_i32 : i32 to vector<8x8xi32>
    %18 = arith.cmpi eq, %3, %17 : vector<8x8xi32>
    %19 = vector.shape_cast %16 : vector<8x1xf32> to vector<8x1xf32>
    %20 = vector.broadcast %19 : vector<8x1xf32> to vector<8x8xf32>
    %21 = arith.select %18, %20, %4 : vector<8x8xi1>, vector<8x8xf32>
    %22 = vector.extract_strided_slice %0 {offsets = [0, 1], sizes = [8, 1], strides = [1, 1]} : vector<8x8xi32> to vector<8x1xi32>
    %23 = vector.broadcast %22 : vector<8x1xi32> to vector<8x128xi32>
    %24 = arith.cmpi eq, %23, %2 : vector<8x128xi32>
    %25 = arith.extui %24 : vector<8x128xi1> to vector<8x128xi32>
    %26 = arith.sitofp %25 : vector<8x128xi32> to vector<8x128xf32>
    %27 = arith.truncf %26 : vector<8x128xf32> to vector<8x128xbf16>
    %cst_5 = arith.constant dense<0.000000e+00> : vector<8x128xf32>
    %28 = tpu.matmul %27, %1, %cst_5 {dimension_numbers = #tpu.dot_dimension_numbers<[1], [0], [0], [1], [0, 0, 1, 1], [], []>} : vector<8x128xbf16>, vector<128x128xbf16>, vector<8x128xf32> -> vector<8x128xf32>
    %29 = vector.extract_strided_slice %28 {offsets = [0, 1], sizes = [8, 1], strides = [1, 1]} : vector<8x128xf32> to vector<8x1xf32>
    %30 = vector.extract_strided_slice %28 {offsets = [0, 2], sizes = [8, 1], strides = [1, 1]} : vector<8x128xf32> to vector<8x1xf32>
    %cst_6 = arith.constant 9.99999993E-9 : f32
    %31 = vector.broadcast %cst_6 : f32 to vector<8x1xf32>
    %32 = arith.maximumf %30, %31 : vector<8x1xf32>
    %33 = arith.divf %29, %32 : vector<8x1xf32>
    %c1_i32 = arith.constant 1 : i32
    %34 = vector.broadcast %c1_i32 : i32 to vector<8x8xi32>
    %35 = arith.cmpi eq, %3, %34 : vector<8x8xi32>
    %36 = vector.shape_cast %33 : vector<8x1xf32> to vector<8x1xf32>
    %37 = vector.broadcast %36 : vector<8x1xf32> to vector<8x8xf32>
    %38 = arith.select %35, %37, %21 : vector<8x8xi1>, vector<8x8xf32>
    %39 = vector.extract_strided_slice %0 {offsets = [0, 2], sizes = [8, 1], strides = [1, 1]} : vector<8x8xi32> to vector<8x1xi32>
    %40 = vector.broadcast %39 : vector<8x1xi32> to vector<8x128xi32>
    %41 = arith.cmpi eq, %40, %2 : vector<8x128xi32>
    %42 = arith.extui %41 : vector<8x128xi1> to vector<8x128xi32>
    %43 = arith.sitofp %42 : vector<8x128xi32> to vector<8x128xf32>
    %44 = arith.truncf %43 : vector<8x128xf32> to vector<8x128xbf16>
    %cst_7 = arith.constant dense<0.000000e+00> : vector<8x128xf32>
    %45 = tpu.matmul %44, %1, %cst_7 {dimension_numbers = #tpu.dot_dimension_numbers<[1], [0], [0], [1], [0, 0, 1, 1], [], []>} : vector<8x128xbf16>, vector<128x128xbf16>, vector<8x128xf32> -> vector<8x128xf32>
    %46 = vector.extract_strided_slice %45 {offsets = [0, 1], sizes = [8, 1], strides = [1, 1]} : vector<8x128xf32> to vector<8x1xf32>
    %47 = vector.extract_strided_slice %45 {offsets = [0, 2], sizes = [8, 1], strides = [1, 1]} : vector<8x128xf32> to vector<8x1xf32>
    %cst_8 = arith.constant 9.99999993E-9 : f32
    %48 = vector.broadcast %cst_8 : f32 to vector<8x1xf32>
    %49 = arith.maximumf %47, %48 : vector<8x1xf32>
    %50 = arith.divf %46, %49 : vector<8x1xf32>
    %c2_i32 = arith.constant 2 : i32
    %51 = vector.broadcast %c2_i32 : i32 to vector<8x8xi32>
    %52 = arith.cmpi eq, %3, %51 : vector<8x8xi32>
    %53 = vector.shape_cast %50 : vector<8x1xf32> to vector<8x1xf32>
    %54 = vector.broadcast %53 : vector<8x1xf32> to vector<8x8xf32>
    %55 = arith.select %52, %54, %38 : vector<8x8xi1>, vector<8x8xf32>
    %56 = vector.extract_strided_slice %0 {offsets = [0, 3], sizes = [8, 1], strides = [1, 1]} : vector<8x8xi32> to vector<8x1xi32>
    %57 = vector.broadcast %56 : vector<8x1xi32> to vector<8x128xi32>
    %58 = arith.cmpi eq, %57, %2 : vector<8x128xi32>
    %59 = arith.extui %58 : vector<8x128xi1> to vector<8x128xi32>
    %60 = arith.sitofp %59 : vector<8x128xi32> to vector<8x128xf32>
    %61 = arith.truncf %60 : vector<8x128xf32> to vector<8x128xbf16>
    %cst_9 = arith.constant dense<0.000000e+00> : vector<8x128xf32>
    %62 = tpu.matmul %61, %1, %cst_9 {dimension_numbers = #tpu.dot_dimension_numbers<[1], [0], [0], [1], [0, 0, 1, 1], [], []>} : vector<8x128xbf16>, vector<128x128xbf16>, vector<8x128xf32> -> vector<8x128xf32>
    %63 = vector.extract_strided_slice %62 {offsets = [0, 1], sizes = [8, 1], strides = [1, 1]} : vector<8x128xf32> to vector<8x1xf32>
    %64 = vector.extract_strided_slice %62 {offsets = [0, 2], sizes = [8, 1], strides = [1, 1]} : vector<8x128xf32> to vector<8x1xf32>
    %cst_10 = arith.constant 9.99999993E-9 : f32
    %65 = vector.broadcast %cst_10 : f32 to vector<8x1xf32>
    %66 = arith.maximumf %64, %65 : vector<8x1xf32>
    %67 = arith.divf %63, %66 : vector<8x1xf32>
    %c3_i32 = arith.constant 3 : i32
    %68 = vector.broadcast %c3_i32 : i32 to vector<8x8xi32>
    %69 = arith.cmpi eq, %3, %68 : vector<8x8xi32>
    %70 = vector.shape_cast %67 : vector<8x1xf32> to vector<8x1xf32>
    %71 = vector.broadcast %70 : vector<8x1xf32> to vector<8x8xf32>
    %72 = arith.select %69, %71, %55 : vector<8x8xi1>, vector<8x8xf32>
    %73 = vector.extract_strided_slice %0 {offsets = [0, 4], sizes = [8, 1], strides = [1, 1]} : vector<8x8xi32> to vector<8x1xi32>
    %74 = vector.broadcast %73 : vector<8x1xi32> to vector<8x128xi32>
    %75 = arith.cmpi eq, %74, %2 : vector<8x128xi32>
    %76 = arith.extui %75 : vector<8x128xi1> to vector<8x128xi32>
    %77 = arith.sitofp %76 : vector<8x128xi32> to vector<8x128xf32>
    %78 = arith.truncf %77 : vector<8x128xf32> to vector<8x128xbf16>
    %cst_11 = arith.constant dense<0.000000e+00> : vector<8x128xf32>
    %79 = tpu.matmul %78, %1, %cst_11 {dimension_numbers = #tpu.dot_dimension_numbers<[1], [0], [0], [1], [0, 0, 1, 1], [], []>} : vector<8x128xbf16>, vector<128x128xbf16>, vector<8x128xf32> -> vector<8x128xf32>
    %80 = vector.extract_strided_slice %79 {offsets = [0, 1], sizes = [8, 1], strides = [1, 1]} : vector<8x128xf32> to vector<8x1xf32>
    %81 = vector.extract_strided_slice %79 {offsets = [0, 2], sizes = [8, 1], strides = [1, 1]} : vector<8x128xf32> to vector<8x1xf32>
    %cst_12 = arith.constant 9.99999993E-9 : f32
    %82 = vector.broadcast %cst_12 : f32 to vector<8x1xf32>
    %83 = arith.maximumf %81, %82 : vector<8x1xf32>
    %84 = arith.divf %80, %83 : vector<8x1xf32>
    %c4_i32 = arith.constant 4 : i32
    %85 = vector.broadcast %c4_i32 : i32 to vector<8x8xi32>
    %86 = arith.cmpi eq, %3, %85 : vector<8x8xi32>
    %87 = vector.shape_cast %84 : vector<8x1xf32> to vector<8x1xf32>
    %88 = vector.broadcast %87 : vector<8x1xf32> to vector<8x8xf32>
    %89 = arith.select %86, %88, %72 : vector<8x8xi1>, vector<8x8xf32>
    %90 = vector.extract_strided_slice %0 {offsets = [0, 5], sizes = [8, 1], strides = [1, 1]} : vector<8x8xi32> to vector<8x1xi32>
    %91 = vector.broadcast %90 : vector<8x1xi32> to vector<8x128xi32>
    %92 = arith.cmpi eq, %91, %2 : vector<8x128xi32>
    %93 = arith.extui %92 : vector<8x128xi1> to vector<8x128xi32>
    %94 = arith.sitofp %93 : vector<8x128xi32> to vector<8x128xf32>
    %95 = arith.truncf %94 : vector<8x128xf32> to vector<8x128xbf16>
    %cst_13 = arith.constant dense<0.000000e+00> : vector<8x128xf32>
    %96 = tpu.matmul %95, %1, %cst_13 {dimension_numbers = #tpu.dot_dimension_numbers<[1], [0], [0], [1], [0, 0, 1, 1], [], []>} : vector<8x128xbf16>, vector<128x128xbf16>, vector<8x128xf32> -> vector<8x128xf32>
    %97 = vector.extract_strided_slice %96 {offsets = [0, 1], sizes = [8, 1], strides = [1, 1]} : vector<8x128xf32> to vector<8x1xf32>
    %98 = vector.extract_strided_slice %96 {offsets = [0, 2], sizes = [8, 1], strides = [1, 1]} : vector<8x128xf32> to vector<8x1xf32>
    %cst_14 = arith.constant 9.99999993E-9 : f32
    %99 = vector.broadcast %cst_14 : f32 to vector<8x1xf32>
    %100 = arith.maximumf %98, %99 : vector<8x1xf32>
    %101 = arith.divf %97, %100 : vector<8x1xf32>
    %c5_i32 = arith.constant 5 : i32
    %102 = vector.broadcast %c5_i32 : i32 to vector<8x8xi32>
    %103 = arith.cmpi eq, %3, %102 : vector<8x8xi32>
    %104 = vector.shape_cast %101 : vector<8x1xf32> to vector<8x1xf32>
    %105 = vector.broadcast %104 : vector<8x1xf32> to vector<8x8xf32>
    %106 = arith.select %103, %105, %89 : vector<8x8xi1>, vector<8x8xf32>
    %107 = vector.extract_strided_slice %0 {offsets = [0, 6], sizes = [8, 1], strides = [1, 1]} : vector<8x8xi32> to vector<8x1xi32>
    %108 = vector.broadcast %107 : vector<8x1xi32> to vector<8x128xi32>
    %109 = arith.cmpi eq, %108, %2 : vector<8x128xi32>
    %110 = arith.extui %109 : vector<8x128xi1> to vector<8x128xi32>
    %111 = arith.sitofp %110 : vector<8x128xi32> to vector<8x128xf32>
    %112 = arith.truncf %111 : vector<8x128xf32> to vector<8x128xbf16>
    %cst_15 = arith.constant dense<0.000000e+00> : vector<8x128xf32>
    %113 = tpu.matmul %112, %1, %cst_15 {dimension_numbers = #tpu.dot_dimension_numbers<[1], [0], [0], [1], [0, 0, 1, 1], [], []>} : vector<8x128xbf16>, vector<128x128xbf16>, vector<8x128xf32> -> vector<8x128xf32>
    %114 = vector.extract_strided_slice %113 {offsets = [0, 1], sizes = [8, 1], strides = [1, 1]} : vector<8x128xf32> to vector<8x1xf32>
    %115 = vector.extract_strided_slice %113 {offsets = [0, 2], sizes = [8, 1], strides = [1, 1]} : vector<8x128xf32> to vector<8x1xf32>
    %cst_16 = arith.constant 9.99999993E-9 : f32
    %116 = vector.broadcast %cst_16 : f32 to vector<8x1xf32>
    %117 = arith.maximumf %115, %116 : vector<8x1xf32>
    %118 = arith.divf %114, %117 : vector<8x1xf32>
    %c6_i32 = arith.constant 6 : i32
    %119 = vector.broadcast %c6_i32 : i32 to vector<8x8xi32>
    %120 = arith.cmpi eq, %3, %119 : vector<8x8xi32>
    %121 = vector.shape_cast %118 : vector<8x1xf32> to vector<8x1xf32>
    %122 = vector.broadcast %121 : vector<8x1xf32> to vector<8x8xf32>
    %123 = arith.select %120, %122, %106 : vector<8x8xi1>, vector<8x8xf32>
    %124 = vector.extract_strided_slice %0 {offsets = [0, 7], sizes = [8, 1], strides = [1, 1]} : vector<8x8xi32> to vector<8x1xi32>
    %125 = vector.broadcast %124 : vector<8x1xi32> to vector<8x128xi32>
    %126 = arith.cmpi eq, %125, %2 : vector<8x128xi32>
    %127 = arith.extui %126 : vector<8x128xi1> to vector<8x128xi32>
    %128 = arith.sitofp %127 : vector<8x128xi32> to vector<8x128xf32>
    %129 = arith.truncf %128 : vector<8x128xf32> to vector<8x128xbf16>
    %cst_17 = arith.constant dense<0.000000e+00> : vector<8x128xf32>
    %130 = tpu.matmul %129, %1, %cst_17 {dimension_numbers = #tpu.dot_dimension_numbers<[1], [0], [0], [1], [0, 0, 1, 1], [], []>} : vector<8x128xbf16>, vector<128x128xbf16>, vector<8x128xf32> -> vector<8x128xf32>
    %131 = vector.extract_strided_slice %130 {offsets = [0, 1], sizes = [8, 1], strides = [1, 1]} : vector<8x128xf32> to vector<8x1xf32>
    %132 = vector.extract_strided_slice %130 {offsets = [0, 2], sizes = [8, 1], strides = [1, 1]} : vector<8x128xf32> to vector<8x1xf32>
    %cst_18 = arith.constant 9.99999993E-9 : f32
    %133 = vector.broadcast %cst_18 : f32 to vector<8x1xf32>
    %134 = arith.maximumf %132, %133 : vector<8x1xf32>
    %135 = arith.divf %131, %134 : vector<8x1xf32>
    %c7_i32 = arith.constant 7 : i32
    %136 = vector.broadcast %c7_i32 : i32 to vector<8x8xi32>
    %137 = arith.cmpi eq, %3, %136 : vector<8x8xi32>
    %138 = vector.shape_cast %135 : vector<8x1xf32> to vector<8x1xf32>
    %139 = vector.broadcast %138 : vector<8x1xf32> to vector<8x8xf32>
    %140 = arith.select %137, %139, %123 : vector<8x8xi1>, vector<8x8xf32>
    %cst_19 = arith.constant dense<0xFF800000> : vector<8xf32>
    %141 = vector.multi_reduction <maximumf>, %140, %cst_19 [1] : vector<8x8xf32> to vector<8xf32>
    %142 = vector.shape_cast %141 : vector<8xf32> to vector<8x1xf32>
    %143 = vector.broadcast %142 : vector<8x1xf32> to vector<8x8xf32>
    %144 = arith.subf %140, %143 : vector<8x8xf32>
    %145 = math.exp %144 : vector<8x8xf32>
    %cst_20 = arith.constant dense<0.000000e+00> : vector<8xf32>
    %146 = vector.multi_reduction <add>, %145, %cst_20 [1] : vector<8x8xf32> to vector<8xf32>
    %147 = vector.shape_cast %146 : vector<8xf32> to vector<8x1xf32>
    %148 = tpu.reciprocal %147 {approx = true} : vector<8x1xf32> -> vector<8x1xf32>
    %149 = vector.broadcast %148 : vector<8x1xf32> to vector<8x8xf32>
    %150 = arith.mulf %145, %149 : vector<8x8xf32>
    %cst_21 = arith.constant 0.000000e+00 : f32
    %151 = vector.broadcast %cst_21 : f32 to vector<8x128xf32>
    %152 = vector.extract_strided_slice %150 {offsets = [0, 0], sizes = [8, 1], strides = [1, 1]} : vector<8x8xf32> to vector<8x1xf32>
    %153 = vector.broadcast %152 : vector<8x1xf32> to vector<8x128xf32>
    %154 = arith.mulf %153, %11 : vector<8x128xf32>
    %155 = arith.addf %151, %154 : vector<8x128xf32>
    %156 = vector.extract_strided_slice %150 {offsets = [0, 1], sizes = [8, 1], strides = [1, 1]} : vector<8x8xf32> to vector<8x1xf32>
    %157 = vector.broadcast %156 : vector<8x1xf32> to vector<8x128xf32>
    %158 = arith.mulf %157, %28 : vector<8x128xf32>
    %159 = arith.addf %155, %158 : vector<8x128xf32>
    %160 = vector.extract_strided_slice %150 {offsets = [0, 2], sizes = [8, 1], strides = [1, 1]} : vector<8x8xf32> to vector<8x1xf32>
    %161 = vector.broadcast %160 : vector<8x1xf32> to vector<8x128xf32>
    %162 = arith.mulf %161, %45 : vector<8x128xf32>
    %163 = arith.addf %159, %162 : vector<8x128xf32>
    %164 = vector.extract_strided_slice %150 {offsets = [0, 3], sizes = [8, 1], strides = [1, 1]} : vector<8x8xf32> to vector<8x1xf32>
    %165 = vector.broadcast %164 : vector<8x1xf32> to vector<8x128xf32>
    %166 = arith.mulf %165, %62 : vector<8x128xf32>
    %167 = arith.addf %163, %166 : vector<8x128xf32>
    %168 = vector.extract_strided_slice %150 {offsets = [0, 4], sizes = [8, 1], strides = [1, 1]} : vector<8x8xf32> to vector<8x1xf32>
    %169 = vector.broadcast %168 : vector<8x1xf32> to vector<8x128xf32>
    %170 = arith.mulf %169, %79 : vector<8x128xf32>
    %171 = arith.addf %167, %170 : vector<8x128xf32>
    %172 = vector.extract_strided_slice %150 {offsets = [0, 5], sizes = [8, 1], strides = [1, 1]} : vector<8x8xf32> to vector<8x1xf32>
    %173 = vector.broadcast %172 : vector<8x1xf32> to vector<8x128xf32>
    %174 = arith.mulf %173, %96 : vector<8x128xf32>
    %175 = arith.addf %171, %174 : vector<8x128xf32>
    %176 = vector.extract_strided_slice %150 {offsets = [0, 6], sizes = [8, 1], strides = [1, 1]} : vector<8x8xf32> to vector<8x1xf32>
    %177 = vector.broadcast %176 : vector<8x1xf32> to vector<8x128xf32>
    %178 = arith.mulf %177, %113 : vector<8x128xf32>
    %179 = arith.addf %175, %178 : vector<8x128xf32>
    %180 = vector.extract_strided_slice %150 {offsets = [0, 7], sizes = [8, 1], strides = [1, 1]} : vector<8x8xf32> to vector<8x1xf32>
    %181 = vector.broadcast %180 : vector<8x1xf32> to vector<8x128xf32>
    %182 = arith.mulf %181, %130 : vector<8x128xf32>
    %183 = arith.addf %179, %182 : vector<8x128xf32>
    %c0_22 = arith.constant 0 : index
    %c0_23 = arith.constant 0 : index
    %184 = vector.load %arg3[%c0_22, %c0_23] : memref<1x128xf32, #tpu.memory_space<vmem>>, vector<1x128xf32>
    %185 = vector.broadcast %184 : vector<1x128xf32> to vector<8x128xf32>
    %186 = arith.addf %183, %185 : vector<8x128xf32>
    %c0_24 = arith.constant 0 : index
    %c0_25 = arith.constant 0 : index
    %187 = vector.load %arg4[%c0_24, %c0_25] : memref<8x128xf32, #tpu.memory_space<vmem>>, vector<8x128xf32>
    tpu.vector_store %arg4[%c0_24, %c0_25], %186 {strides = array<i32>} : memref<8x128xf32, #tpu.memory_space<vmem>>, vector<8x128xf32>,
    return
  }
  func.func @transform_0(%arg0: i32) -> (i32, i32) {
    %c0_i32 = arith.constant 0 : i32
    %c0_i32_0 = arith.constant 0 : i32
    return %arg0, %c0_i32 : i32, i32
  }
  func.func @transform_1(%arg0: i32) -> (i32, i32) {
    %c0_i32 = arith.constant 0 : i32
    %c0_i32_0 = arith.constant 0 : i32
    %c0_i32_1 = arith.constant 0 : i32
    return %c0_i32, %c0_i32_0 : i32, i32
  }
  func.func @transform_2(%arg0: i32) -> (i32, i32) {
    %c0_i32 = arith.constant 0 : i32
    %c0_i32_0 = arith.constant 0 : i32
    %c0_i32_1 = arith.constant 0 : i32
    return %c0_i32, %c0_i32_0 : i32, i32
  }
  func.func @transform_3(%arg0: i32) -> (i32, i32) {
    %c0_i32 = arith.constant 0 : i32
    %c0_i32_0 = arith.constant 0 : i32
    return %arg0, %c0_i32 : i32, i32
  }
}

</mosaic_0001>

<bundles_post_ra>
// kernel: tpu_custom_call.1
= control target key start
LH: loop header
LB: loop body
LE: loop exit
PB: predicated region body
PF: predicated region fallthrough
CT: control target
= control target key end

     0   :  { %8 = vsyncpa [#allocation3], 0  ;;  %s1798_s0 = inlined_call_operand.vmem [shape: s32[16,8], index: 0, kind: input, shape index: {}]   ;;  %s1799_s1 = inlined_call_operand.hbm [shape: bf16[128,128], index: 1, kind: input, shape index: {}]   ;;  %s1800_s2 = inlined_call_operand.vmem [shape: f32[1,128], index: 2, kind: input, shape index: {}]   ;;  %s1801_s3 = inlined_call_operand.hbm [shape: f32[16,128], index: 3, kind: output, shape index: {}]  }
   0x1   :  { %9 = vsyncpa [#allocation4], 0 }
   0x2   :  { %11 = vsyncpa [#allocation4 + $0x1], 0  ;;  %s1411_s12 = smov 0   ;;  %s1413_s13 = smov 0  }
   0x3   :  { %s1415_s14 = smov 0   ;;  %s1417_s15 = smov 0  }
   0x4 LB: > { %s1432_s16 = sadd.s32 4294967295, %s1373_s15   ;;  %s892_s17 = sadd.s32 4294967294, %s1373_s15   ;;  %s1373_s15 = sphi %s1417_s15, %s1817_s15   ;;  %s1369_s14 = sphi %s1415_s14, %s1816_s14   ;;  %s1365_s13 = sphi %s1413_s13, %s1815_s13   ;;  %s1361_s12 = sphi %s1411_s12, %s1814_s12  }
   0x5   : > { %s1436_s18 = sadd.s32 1, %s1373_s15   ;;  %s92_s19 = sadd.s32 1, %s1369_s14 }
   0x6   : > { %s89_s20 = ssub.s32 %s1373_s15, %s1436_s18  ;;  %p102_p0 = scmp.ne.s32.totalorder %s1369_s14, %s1365_s13 }
   0x7   : > { %p90_p1 = scmp.eq.s32.totalorder %s89_s20, 0  ;;  %p103_p2 = scmp.eq.s32.totalorder %s1432_s16, 1 }
   0x8   : > { %p108_p3 = scmp.ne.s32.totalorder %s1365_s13, %s1361_s12  ;;  %p109_p4 = scmp.eq.s32.totalorder %s892_s17, 1 }
   0x9   : > { %s1447_s21 = scalar_select %p90_p1, %s1369_s14, %s92_s19  }
   0xa   : > { %p1449_p5 = por %p103_p2, %p102_p0  ;;  %p1453_p6 = por %p109_p4, %p108_p3 }
   0xb   : > { %p893_p7 = scmp.ge.s32.totalorder %s1373_s15, 1  ;;  %p116_p8 = scmp.lt.s32.totalorder %s1373_s15, 3 }
   0xc   : > { %s1805_s22 = scalar_select %p1449_p5, 1, 0 }
   0xd   : > { %s1806_s23 = scalar_select %p1453_p6, 1, 0 }
   0xe   : > { %p1802_p9 = scmp.eq.s32.totalorder %s1432_s16, 0  ;;  %p1460_p10 = pnand %p893_p7, %p116_p8 }
   0xf   : > { %s1375_s25 = smov [#allocation2]   ;;  %s1279_s30 = scalar_lea.hbm %s1799_s1, 1024 }
  0x10   : > { %s1807_s24 = scalar_select %p1460_p10, 1, 0 }
  0x11   : > { %s128_s26 = sshll.u32 %s1375_s25, 4  ;;  %p1175_p11 = pneg %p1460_p10  ;;  %s129_s26 = int_to_ptr.vmem [resolvable:$true] %s128_s26 }
  0x12   : > { %p1280_p13 = scmp.ne.s32.totalorder %s1799_s1, %s1279_s30  ;;  %p1286_p3 = scmp.lt.u32.totalorder %s1279_s30, %s1799_s1 }
  0x13   : > { %p1468_p12 = pnand %p1802_p9, %p1175_p11 }
  0x15   : > { %p1281_p0 = pneg %p1468_p12 }
  0x17   : > { %p1282_p1 = pnand %p1281_p0, %p1280_p13 }
  0x19   : > { %p1283_p2 = pneg %p1282_p1 }
  0x1b   : > { %p1288_p4 = pnand %p1286_p3, %p1283_p2 }
  0x1d   : > { %1291 = shalt.err (!%p1288_p4)
}
  0x1e   : > { %s1292_s8 = scalar_lea.vmem %s129_s26, 1024  ;;  %p1300_p9 = scmp.lt.s32.totalorder %s129_s26, %s129_s26 }
  0x1f   : > { %p1293_p7 = scmp.ne.s32.totalorder %s129_s26, %s1292_s8  ;;  %p1301_p6 = scmp.lt.s32.totalorder %s1292_s8, %s1292_s8 }
  0x21   : > { %p1295_p8 = pnand %p1293_p7, %p1281_p0  ;;  %p1302_p5 = por %p1301_p6, %p1300_p9 }
  0x23   : > { %p1296_p11 = pneg %p1295_p8 }
  0x25   : > { %p1303_p10 = pnand %p1302_p5, %p1296_p11 }
  0x27   : > { %1306 = shalt.err (!%p1303_p10)
}
  0x28   : > { %s1376_s9 = smov 64   ;;  %s1377_s10 = smov 4  }
  0x29   : > { %1178 = dma.hbm_to_vmem [thread:$0]  (!%p1468_p12), %s1799_s1, 1024, %s129_s26, [#allocation3], %s1376_s9, %s1376_s9, %s1377_s10  }
  0x2a   : > { %p1809_p13 = scmp.ne.s32.totalorder %s1807_s24, 0 }
  0x2b   : > { %p1810_p1 = scmp.eq.s32.totalorder (!%p1809_p13), %s1432_s16, 0 }
  0x2c   : > { %154 = sbr.rel (%p1809_p13) target bundleno = 1253 (0x4e5), region = 32 }
  0x33   : > { %1352 = dma.done.wait (%p1810_p1), [#allocation3], 1024   ;;  %p1811_p0 = pmov %p1810_p1 }
  0x34   : > { %p177_p5 = scmp.lt.s32.totalorder %s1432_s16, 1  ;;  %v1378_v0 = vmov 0   ;;  %v1379_v1 = vmov 2   ;;  %v1380_v2 = vmov 0.0   ;;  %v1503_v4 = vld [vmem:[#allocation2] sm:$0xff]   ;;  %vm1381_vm0 = vmmov 0  }
  0x35   : > { %1354 = vsyncadd (%p1811_p0), [#allocation3], 4294966272  ;;  %1233 = vset.pattern.permute.xlu0 %v1378_v0  ;;  %1235 = vset.pattern.permute.xlu1 %v1379_v1  ;;  %v1510_v5 = vld [vmem:[#allocation2 + $0x8] sm:$0xff]   ;;  %v1382_v6 = vmov 1   ;;  %v1383_v7 = vmov 3   ;;  %v1519_v8 = vld [vmem:[#allocation2 + $0x10] sm:$0xff]   ;;  %v199_v18 = vlaneseq }
  0x36   : > { %s178_s19 = scalar_select %p177_p5, %s1432_s16, 1  ;;  %1009 = vmatprep.subr.bf16.mxu0 %v1380_v2  ;;  %1029 = vmatprep.subr.bf16.mxu1 %v1380_v2  ;;  %v1384_v9 = vmov 4   ;;  %v1385_v10 = vmov 5   ;;  %v1525_v11 = vld [vmem:[#allocation2 + $0x18] sm:$0xff]   ;;  %v1386_v12 = vmov 6   ;;  %v1532_v13 = vld [vmem:[#allocation2 + $0x20] sm:$0xff]  }
  0x37   : > { %1025 = vmatprep.mubr.msk.bf16.mxu0 %vm1381_vm0, %v1380_v2  ;;  %1045 = vmatprep.mubr.msk.bf16.mxu1 %vm1381_vm0, %v1380_v2  ;;  %v1387_v14 = vmov 7   ;;  %v1539_v15 = vld [vmem:[#allocation2 + $0x28] sm:$0xff]   ;;  %v1545_v16 = vld [vmem:[#allocation2 + $0x30] sm:$0xff]   ;;  %v1551_v17 = vld [vmem:[#allocation2 + $0x38] sm:$0xff]   ;;  %v1560_v19 = vand.u32 127, %v199_v18  ;;  %s1389_s27 = smov 127  }
  0x38   : > { %s899_s20 = sshll.u32 %s178_s19, 3  ;;  %1010 = vmatpush3.bf16.msra.mxu0 %v1503_v4  ;;  %1030 = vmatpush3.bf16.msra.mxu1 %v1503_v4  ;;  %v1388_v21 = vmov 1.0|1.0   ;;  %s174_s28 = sand.u32 1, %s1365_s13  }
  0x39   : > { %s180_s26 = scalar_lea.vmem %s1798_s0, %s899_s20  ;;  %1011 = vmatprep.subr.bf16.mxu0 %v1380_v2  ;;  %1031 = vmatprep.subr.bf16.mxu1 %v1380_v2  ;;  %s898_s29 = sshll.u32 %s174_s28, 3 }
  0x3a   : > { %v182_v3 = vld [vmem:[%s180_s26] sm:$0xff]  ;;  %s934_s5 = sshll.u32 %s1432_s16, 7  ;;  %s176_s6 = scalar_lea.vmem [#allocation5], %s898_s29 }
  0x3b   : > { %202 = vperm.xlu0 %1233, %v182_v3   ;;  %372 = vperm.xlu1 %1235, %v182_v3   ;;  %s821_s7 = sshll.u32 %s176_s6, 4  ;;  %s1756_s10 = scalar_lea.hbm %s1801_s3, %s934_s5  ;;  %s1758_s7 = int_to_ptr.vmem [resolvable:$true] %s821_s7 }
  0x3c   : > { %1012 = vmatpush3.bf16.msra.mxu0 %v1510_v5  ;;  %1032 = vmatpush3.bf16.msra.mxu1 %v1510_v5  ;;  %s808_s11 = scalar_lea.sflag [#allocation4], %s174_s28  ;;  %s1307_s17 = scalar_lea.vmem %s1758_s7, 128 }
  0x3d   : > { %1013 = vmatprep.subr.bf16.mxu0 %v1380_v2  ;;  %1033 = vmatprep.subr.bf16.mxu1 %v1380_v2  ;;  %p1308_p6 = scmp.ne.s32.totalorder %s1758_s7, %s1307_s17  ;;  %p1812_p9 = scmp.ne.s32.totalorder %s1805_s22, 0 }
  0x3e   : > { %s1390_s16 = smov [#allocation5]  }
  0x3f   : > { %1234 = vset.pattern.permute.xlu0 %v1382_v6  ;;  %1236 = vset.pattern.permute.xlu1 %v1383_v7  ;;  %p1309_p10 = pnand %p1308_p6, %p1812_p9  ;;  %s1311_s19 = sshll.u32 %s1390_s16, 4  ;;  %s1312_s19 = int_to_ptr.vmem [resolvable:$false] %s1311_s19 }
  0x40   : > { %311 = vperm.xlu0 %1234, %v182_v3   ;;  %433 = vperm.xlu1 %1236, %v182_v3   ;;  %s1313_s20 = scalar_lea.vmem %s1312_s19, 256  ;;  %p1314_p2 = scmp.lt.s32.totalorder %s1758_s7, %s1312_s19 }
  0x41   : > { %1014 = vmatpush3.bf16.msra.mxu0 %v1519_v8  ;;  %1034 = vmatpush3.bf16.msra.mxu1 %v1519_v8  ;;  %p1310_p12 = pneg %p1309_p10  ;;  %p1315_p3 = scmp.lt.s32.totalorder %s1313_s20, %s1307_s17 }
  0x42   : > { %1015 = vmatprep.subr.bf16.mxu0 %v1380_v2  ;;  %1035 = vmatprep.subr.bf16.mxu1 %v1380_v2 }
  0x43   : > { %p1316_p4 = por %p1315_p3, %p1314_p2 }
  0x44   : > { %1237 = vset.pattern.permute.xlu1 %v1384_v9  ;;  %1238 = vset.pattern.permute.xlu0 %v1385_v10 }
  0x45   : > { %494 = vperm.xlu1 %1237, %v182_v3   ;;  %555 = vperm.xlu0 %1238, %v182_v3   ;;  %p1317_p7 = pnand %p1316_p4, %p1310_p12 }
  0x46   : > { %1016 = vmatpush3.bf16.msra.mxu0 %v1525_v11  ;;  %1036 = vmatpush3.bf16.msra.mxu1 %v1525_v11 }
  0x47   : > { %1017 = vmatprep.subr.bf16.mxu0 %v1380_v2  ;;  %1037 = vmatprep.subr.bf16.mxu1 %v1380_v2 }
  0x49   : > { %1239 = vset.pattern.permute.xlu1 %v1386_v12  ;;  %1241 = vset.pattern.permute.xlu0 %v1382_v6 }
  0x4a   : > { %616 = vperm.xlu1 %1239, %v182_v3   ;;  %1018 = vmatpush3.bf16.msra.mxu0 %v1532_v13 }
  0x4b   : > { %1019 = vmatprep.subr.bf16.mxu0 %v1380_v2  ;;  %1038 = vmatpush3.bf16.msra.mxu1 %v1532_v13 }
  0x4c   : > { %1039 = vmatprep.subr.bf16.mxu1 %v1380_v2 }
  0x4e   : > { %1240 = vset.pattern.permute.xlu1 %v1387_v14  ;;  %1020 = vmatpush3.bf16.msra.mxu0 %v1539_v15 }
  0x4f   : > { %677 = vperm.xlu1 %1240, %v182_v3   ;;  %1021 = vmatprep.subr.bf16.mxu0 %v1380_v2 }
  0x50   : > { %1040 = vmatpush3.bf16.msra.mxu1 %v1539_v15 }
  0x51   : > { %1041 = vmatprep.subr.bf16.mxu1 %v1380_v2 }
  0x52   : > { %1022 = vmatpush3.bf16.msra.mxu0 %v1545_v16 }
  0x53   : > { %1242 = vset.pattern.permute.xlu1 %v1382_v6  ;;  %1023 = vmatprep.subr.bf16.mxu0 %v1380_v2 }
  0x54   : > { %1042 = vmatpush3.bf16.msra.mxu1 %v1545_v16 }
  0x55   : > { %1043 = vmatprep.subr.bf16.mxu1 %v1380_v2 }
  0x56   : > { %1024 = vmatpush3.bf16.msra.mxu0 %v1551_v17 }
  0x57   : > { %1049 = vmatprep.subr.bf16.mxu0 %v1380_v2 }
  0x58   : > { %1044 = vmatpush3.bf16.msra.mxu1 %v1551_v17 }
  0x59   : > { %1069 = vmatprep.subr.bf16.mxu1 %v1380_v2 }
  0xba   : > { %v203_v20 = vpop.permute.xlu0 %202  ;;  %v373_v23 = vpop.permute.xlu1 %372 }
  0xbb   : > { %vm204_vm1 = vcmp.eq.s32.totalorder %v203_v20, %v1560_v19  ;;  %vm374_vm5 = vcmp.eq.s32.totalorder %v373_v23, %v1560_v19 }
  0xbc   : > { %vm909_vm2 = vmpackc.low %vm204_vm1, %vm204_vm1  ;;  %vm303_vm1 = vcmp.eq.s32.totalorder %v1560_v19, 0 }
  0xbd   : > { %1026 = vmatmul.mubr.msk.bf16.vlgmr.msra.gmra.mrb[0].mxu0 %vm909_vm2, %v1388_v21  ;;  %vm915_vm6 = vmpackc.low %vm374_vm5, %vm374_vm5  ;;  %vm364_vm2 = vcmp.eq.s32.totalorder %v1560_v19, 1  ;;  %vm547_vm5 = vcmp.eq.s32.totalorder %v1560_v19, 4 }
  0xbe   : > { %1050 = vmatpush3.bf16.msra.mxu0 %v1503_v4  ;;  %1065 = vmatprep.mubr.msk.bf16.mxu0 %vm1381_vm0, %v1380_v2 }
  0xbf   : > { %v312_v22 = vpop.permute.xlu0 %311  ;;  %1051 = vmatprep.subr.bf16.mxu0 %v1380_v2  ;;  %v434_v24 = vpop.permute.xlu1 %433 }
  0xc0   : > { %vm313_vm3 = vcmp.eq.s32.totalorder %v312_v22, %v1560_v19  ;;  %vm435_vm7 = vcmp.eq.s32.totalorder %v434_v24, %v1560_v19 }
  0xc1   : > { %vm912_vm4 = vmpackc.low %vm313_vm3, %vm313_vm3  ;;  %vm425_vm3 = vcmp.eq.s32.totalorder %v1560_v19, 2 }
  0xc2   : > { %1052 = vmatpush3.bf16.msra.mxu0 %v1510_v5  ;;  %1046 = vmatmul.mubr.msk.bf16.vlgmr.msra.gmra.mrb[0].mxu1 %vm912_vm4, %v1388_v21  ;;  %vm918_vm8 = vmpackc.low %vm435_vm7, %vm435_vm7  ;;  %vm486_vm4 = vcmp.eq.s32.totalorder %v1560_v19, 3  ;;  %vm669_vm7 = vcmp.eq.s32.totalorder %v1560_v19, 6 }
  0xc3   : > { %1070 = vmatpush3.bf16.msra.mxu1 %v1503_v4  ;;  %1053 = vmatprep.subr.bf16.mxu0 %v1380_v2 }
  0xc4   : > { %1071 = vmatprep.subr.bf16.mxu1 %v1380_v2  ;;  %1085 = vmatprep.mubr.msk.bf16.mxu1 %vm1381_vm0, %v1380_v2  ;;  %v495_v25 = vpop.permute.xlu1 %494  ;;  %v556_v26 = vpop.permute.xlu0 %555 }
  0xc5   : > { %vm496_vm9 = vcmp.eq.s32.totalorder %v495_v25, %v1560_v19  ;;  %vm557_vm11 = vcmp.eq.s32.totalorder %v556_v26, %v1560_v19 }
  0xc6   : > { %1054 = vmatpush3.bf16.msra.mxu0 %v1519_v8  ;;  %vm921_vm10 = vmpackc.low %vm496_vm9, %vm496_vm9  ;;  %vm737_vm9 = vcmask 64512  }
  0xc7   : > { %1072 = vmatpush3.bf16.msra.mxu1 %v1510_v5  ;;  %1055 = vmatprep.subr.bf16.mxu0 %v1380_v2  ;;  %vm924_vm12 = vmpackc.low %vm557_vm11, %vm557_vm11 }
  0xc8   : > { %1073 = vmatprep.subr.bf16.mxu1 %v1380_v2 }
  0xc9   : > { %v617_v27 = vpop.permute.xlu1 %616 }
  0xca   : > { %1056 = vmatpush3.bf16.msra.mxu0 %v1525_v11  ;;  %vm618_vm13 = vcmp.eq.s32.totalorder %v617_v27, %v1560_v19 }
  0xcb   : > { %1074 = vmatpush3.bf16.msra.mxu1 %v1519_v8  ;;  %1057 = vmatprep.subr.bf16.mxu0 %v1380_v2  ;;  %vm927_vm14 = vmpackc.low %vm618_vm13, %vm618_vm13 }
  0xcc   : > { %1075 = vmatprep.subr.bf16.mxu1 %v1380_v2 }
  0xce   : > { %1058 = vmatpush3.bf16.msra.mxu0 %v1532_v13  ;;  %v678_v28 = vpop.permute.xlu1 %677 }
  0xcf   : > { %1076 = vmatpush3.bf16.msra.mxu1 %v1525_v11  ;;  %1059 = vmatprep.subr.bf16.mxu0 %v1380_v2  ;;  %vm679_vm15 = vcmp.eq.s32.totalorder %v678_v28, %v1560_v19 }
  0xd0   : > { %1077 = vmatprep.subr.bf16.mxu1 %v1380_v2 }
  0xd2   : > { %1060 = vmatpush3.bf16.msra.mxu0 %v1539_v15 }
  0xd3   : > { %1078 = vmatpush3.bf16.msra.mxu1 %v1532_v13  ;;  %1061 = vmatprep.subr.bf16.mxu0 %v1380_v2 }
  0xd4   : > { %1079 = vmatprep.subr.bf16.mxu1 %v1380_v2 }
  0xd6   : > { %1062 = vmatpush3.bf16.msra.mxu0 %v1545_v16 }
  0xd7   : > { %1080 = vmatpush3.bf16.msra.mxu1 %v1539_v15  ;;  %1063 = vmatprep.subr.bf16.mxu0 %v1380_v2 }
  0xd8   : > { %1081 = vmatprep.subr.bf16.mxu1 %v1380_v2 }
  0xda   : > { %1064 = vmatpush3.bf16.msra.mxu0 %v1551_v17 }
  0xdb   : > { %1082 = vmatpush3.bf16.msra.mxu1 %v1545_v16  ;;  %1089 = vmatprep.subr.bf16.mxu0 %v1380_v2 }
  0xdc   : > { %1083 = vmatprep.subr.bf16.mxu1 %v1380_v2 }
  0xdd   : > { %1066 = vmatmul.mubr.msk.bf16.vlgmr.msra.gmra.mrb[4].mxu0 %vm915_vm6, %v1388_v21  ;;  %vm608_vm6 = vcmp.eq.s32.totalorder %v1560_v19, 5 }
  0xde   : > { %1090 = vmatpush3.bf16.msra.mxu0 %v1503_v4  ;;  %1105 = vmatprep.mubr.msk.bf16.mxu0 %vm1381_vm0, %v1380_v2 }
  0xdf   : > { %1084 = vmatpush3.bf16.msra.mxu1 %v1551_v17  ;;  %1091 = vmatprep.subr.bf16.mxu0 %v1380_v2 }
  0xe0   : > { %1109 = vmatprep.subr.bf16.mxu1 %v1380_v2 }
  0xe2   : > { %1086 = vmatmul.mubr.msk.bf16.vlgmr.msra.gmra.mrb[4].mxu1 %vm918_vm8, %v1388_v21  ;;  %1092 = vmatpush3.bf16.msra.mxu0 %v1510_v5  ;;  %vm730_vm8 = vcmp.eq.s32.totalorder %v1560_v19, 7 }
  0xe3   : > { %1110 = vmatpush3.bf16.msra.mxu1 %v1503_v4  ;;  %1093 = vmatprep.subr.bf16.mxu0 %v1380_v2 }
  0xe4   : > { %1111 = vmatprep.subr.bf16.mxu1 %v1380_v2  ;;  %1125 = vmatprep.mubr.msk.bf16.mxu1 %vm1381_vm0, %v1380_v2 }
  0xe6   : > { %1094 = vmatpush3.bf16.msra.mxu0 %v1519_v8 }
  0xe7   : > { %1112 = vmatpush3.bf16.msra.mxu1 %v1510_v5  ;;  %1095 = vmatprep.subr.bf16.mxu0 %v1380_v2 }
  0xe8   : > { %1113 = vmatprep.subr.bf16.mxu1 %v1380_v2 }
  0xea   : > { %1096 = vmatpush3.bf16.msra.mxu0 %v1525_v11 }
  0xeb   : > { %1114 = vmatpush3.bf16.msra.mxu1 %v1519_v8  ;;  %1097 = vmatprep.subr.bf16.mxu0 %v1380_v2 }
  0xec   : > { %1115 = vmatprep.subr.bf16.mxu1 %v1380_v2 }
  0xee   : > { %1098 = vmatpush3.bf16.msra.mxu0 %v1532_v13 }
  0xef   : > { %1116 = vmatpush3.bf16.msra.mxu1 %v1525_v11  ;;  %1099 = vmatprep.subr.bf16.mxu0 %v1380_v2 }
  0xf0   : > { %1117 = vmatprep.subr.bf16.mxu1 %v1380_v2 }
  0xf2   : > { %1100 = vmatpush3.bf16.msra.mxu0 %v1539_v15 }
  0xf3   : > { %1118 = vmatpush3.bf16.msra.mxu1 %v1532_v13  ;;  %1101 = vmatprep.subr.bf16.mxu0 %v1380_v2 }
  0xf4   : > { %1119 = vmatprep.subr.bf16.mxu1 %v1380_v2 }
  0xf6   : > { %1102 = vmatpush3.bf16.msra.mxu0 %v1545_v16 }
  0xf7   : > { %1120 = vmatpush3.bf16.msra.mxu1 %v1539_v15  ;;  %1103 = vmatprep.subr.bf16.mxu0 %v1380_v2 }
  0xf8   : > { %1121 = vmatprep.subr.bf16.mxu1 %v1380_v2 }
  0xfa   : > { %1104 = vmatpush3.bf16.msra.mxu0 %v1551_v17 }
  0xfb   : > { %1122 = vmatpush3.bf16.msra.mxu1 %v1545_v16  ;;  %1129 = vmatprep.subr.bf16.mxu0 %v1380_v2 }
  0xfc   : > { %1123 = vmatprep.subr.bf16.mxu1 %v1380_v2 }
  0xfd   : > { %1106 = vmatmul.mubr.msk.bf16.vlgmr.msra.gmra.mrb[8].mxu0 %vm921_vm10, %v1388_v21 }
  0xfe   : > { %1130 = vmatpush3.bf16.msra.mxu0 %v1503_v4  ;;  %1145 = vmatprep.mubr.msk.bf16.mxu0 %vm1381_vm0, %v1380_v2 }
  0xff   : > { %1124 = vmatpush3.bf16.msra.mxu1 %v1551_v17  ;;  %1131 = vmatprep.subr.bf16.mxu0 %v1380_v2 }
 0x100   : > { %1149 = vmatprep.subr.bf16.mxu1 %v1380_v2 }
 0x102   : > { %1126 = vmatmul.mubr.msk.bf16.vlgmr.msra.gmra.mrb[8].mxu1 %vm924_vm12, %v1388_v21  ;;  %1132 = vmatpush3.bf16.msra.mxu0 %v1510_v5 }
 0x103   : > { %1150 = vmatpush3.bf16.msra.mxu1 %v1503_v4  ;;  %1133 = vmatprep.subr.bf16.mxu0 %v1380_v2 }
 0x104   : > { %1151 = vmatprep.subr.bf16.mxu1 %v1380_v2  ;;  %1165 = vmatprep.mubr.msk.bf16.mxu1 %vm1381_vm0, %v1380_v2  ;;  %vm930_vm0 = vmpackc.low %vm679_vm15, %vm679_vm15 }
 0x106   : > { %1134 = vmatpush3.bf16.msra.mxu0 %v1519_v8 }
 0x107   : > { %1152 = vmatpush3.bf16.msra.mxu1 %v1510_v5  ;;  %1135 = vmatprep.subr.bf16.mxu0 %v1380_v2 }
 0x108   : > { %1153 = vmatprep.subr.bf16.mxu1 %v1380_v2 }
 0x10a   : > { %1136 = vmatpush3.bf16.msra.mxu0 %v1525_v11 }
 0x10b   : > { %1154 = vmatpush3.bf16.msra.mxu1 %v1519_v8  ;;  %1137 = vmatprep.subr.bf16.mxu0 %v1380_v2 }
 0x10c   : > { %1155 = vmatprep.subr.bf16.mxu1 %v1380_v2 }
 0x10e   : > { %1138 = vmatpush3.bf16.msra.mxu0 %v1532_v13 }
 0x10f   : > { %1156 = vmatpush3.bf16.msra.mxu1 %v1525_v11  ;;  %1139 = vmatprep.subr.bf16.mxu0 %v1380_v2 }
 0x110   : > { %1157 = vmatprep.subr.bf16.mxu1 %v1380_v2 }
 0x112   : > { %1140 = vmatpush3.bf16.msra.mxu0 %v1539_v15 }
 0x113   : > { %1158 = vmatpush3.bf16.msra.mxu1 %v1532_v13  ;;  %1141 = vmatprep.subr.bf16.mxu0 %v1380_v2 }
 0x114   : > { %1159 = vmatprep.subr.bf16.mxu1 %v1380_v2 }
 0x116   : > { %1142 = vmatpush3.bf16.msra.mxu0 %v1545_v16 }
 0x117   : > { %1160 = vmatpush3.bf16.msra.mxu1 %v1539_v15  ;;  %1143 = vmatprep.subr.bf16.mxu0 %v1380_v2 }
 0x118   : > { %1161 = vmatprep.subr.bf16.mxu1 %v1380_v2 }
 0x11a   : > { %1144 = vmatpush3.bf16.msra.mxu0 %v1551_v17 }
 0x11b   : > { %1162 = vmatpush3.bf16.msra.mxu1 %v1545_v16 }
 0x11c   : > { %1163 = vmatprep.subr.bf16.mxu1 %v1380_v2 }
 0x11d   : > { %1146 = vmatmul.mubr.msk.bf16.vlgmr.msra.gmra.mrb[12].mxu0 %vm927_vm14, %v1388_v21 }
 0x11f   : > { %1164 = vmatpush3.bf16.msra.mxu1 %v1551_v17 }
 0x122   : > { %1166 = vmatmul.mubr.msk.bf16.vlgmr.msra.gmra.mrb[12].mxu1 %vm930_vm0, %v1388_v21 }
 0x190   : > { %v1684_v29 = vpop.f32.mrb[0].mxu0 }
 0x191   : > { %v296_v30 = vmax.f32 %v1684_v29, 1e-08  ;;  %v1027_v31 = vpop.f32.mrb[1].mxu0 }
 0x192   : > { %v293_v32 = vpop.f32.mrb[2].mxu0 }
 0x193   : > { %298 = vrot.lane.b32.xlu0 %v296_v30, %s1389_s27  ;;  %v1028_v33 = vpop.f32.mrb[3].mxu0 }
 0x195   : > { %v1688_v34 = vpop.f32.mrb[0].mxu1 }
 0x196   : > { %v357_v35 = vmax.f32 %v1688_v34, 1e-08  ;;  %v1047_v36 = vpop.f32.mrb[1].mxu1 }
 0x197   : > { %v354_v37 = vpop.f32.mrb[2].mxu1 }
 0x198   : > { %359 = vrot.lane.b32.xlu1 %v357_v35, %s1389_s27  ;;  %v1048_v38 = vpop.f32.mrb[3].mxu1 }
 0x1b0   : > { %v1692_v39 = vpop.f32.mrb[4].mxu0 }
 0x1b1   : > { %v418_v40 = vmax.f32 %v1692_v39, 1e-08  ;;  %v1067_v41 = vpop.f32.mrb[5].mxu0 }
 0x1b2   : > { %v415_v42 = vpop.f32.mrb[6].mxu0 }
 0x1b3   : > { %420 = vrot.lane.b32.xlu0 %v418_v40, %s1389_s27  ;;  %v1068_v43 = vpop.f32.mrb[7].mxu0 }
 0x1b5   : > { %v1696_v44 = vpop.f32.mrb[4].mxu1 }
 0x1b6   : > { %v479_v45 = vmax.f32 %v1696_v44, 1e-08  ;;  %v1087_v46 = vpop.f32.mrb[5].mxu1 }
 0x1b7   : > { %v476_v47 = vpop.f32.mrb[6].mxu1 }
 0x1b8   : > { %481 = vrot.lane.b32.xlu1 %v479_v45, %s1389_s27  ;;  %v1088_v48 = vpop.f32.mrb[7].mxu1 }
 0x1d0   : > { %v1700_v49 = vpop.f32.mrb[8].mxu0 }
 0x1d1   : > { %v540_v50 = vmax.f32 %v1700_v49, 1e-08  ;;  %v1107_v51 = vpop.f32.mrb[9].mxu0 }
 0x1d2   : > { %v537_v52 = vpop.f32.mrb[10].mxu0 }
 0x1d3   : > { %542 = vrot.lane.b32.xlu0 %v540_v50, %s1389_s27  ;;  %v1108_v53 = vpop.f32.mrb[11].mxu0 }
 0x1d5   : > { %v1704_v54 = vpop.f32.mrb[8].mxu1 }
 0x1d6   : > { %v601_v55 = vmax.f32 %v1704_v54, 1e-08  ;;  %v1127_v56 = vpop.f32.mrb[9].mxu1 }
 0x1d7   : > { %v598_v57 = vpop.f32.mrb[10].mxu1 }
 0x1d8   : > { %603 = vrot.lane.b32.xlu1 %v601_v55, %s1389_s27  ;;  %v1128_v58 = vpop.f32.mrb[11].mxu1 }
 0x1f0   : > { %v1708_v59 = vpop.f32.mrb[12].mxu0 }
 0x1f1   : > { %v662_v60 = vmax.f32 %v1708_v59, 1e-08  ;;  %v1147_v61 = vpop.f32.mrb[13].mxu0 }
 0x1f2   : > { %v659_v62 = vpop.f32.mrb[14].mxu0 }
 0x1f3   : > { %664 = vrot.lane.b32.xlu0 %v662_v60, %s1389_s27  ;;  %v1148_v63 = vpop.f32.mrb[15].mxu0 }
 0x1f5   : > { %v1712_v2 = vpop.f32.mrb[12].mxu1 }
 0x1f6   : > { %v723_v3 = vmax.f32 %v1712_v2, 1e-08  ;;  %v1167_v4 = vpop.f32.mrb[13].mxu1 }
 0x1f7   : > { %v720_v5 = vpop.f32.mrb[14].mxu1 }
 0x1f8   : > { %725 = vrot.lane.b32.xlu1 %v723_v3, %s1389_s27  ;;  %v1168_v6 = vpop.f32.mrb[15].mxu1 }
 0x205   : > { %v299_v8 = vpop.permute.xlu0 %298 }
 0x206   : > { %1259 = vrcp.f32 %v299_v8 }
 0x20a   : > { %v360_v11 = vpop.permute.xlu1 %359 }
 0x20b   : > { %1261 = vrcp.f32 %v360_v11 }
 0x210   : > { %v1260_v13 = vpop.eup %1259 }
 0x211   : > { %v302_v15 = vmul.f32 %v1260_v13, %v1684_v29 }
 0x213   : > { %306 = vperm.xlu0 %1241, %v302_v15  }
 0x215   : > { %v1262_v16 = vpop.eup %1261 }
 0x216   : > { %v363_v17 = vmul.f32 %v1262_v16, %v1688_v34 }
 0x218   : > { %367 = vperm.xlu1 %1242, %v363_v17  }
 0x225   : > { %v421_v18 = vpop.permute.xlu0 %420 }
 0x226   : > { %1263 = vrcp.f32 %v421_v18 }
 0x22a   : > { %v482_v20 = vpop.permute.xlu1 %481 }
 0x22b   : > { %1265 = vrcp.f32 %v482_v20 }
 0x230   : > { %v1264_v21 = vpop.eup %1263 }
 0x231   : > { %v424_v22 = vmul.f32 %v1264_v21, %v1692_v39 }
 0x233   : > { %428 = vperm.xlu1 %1242, %v424_v22  }
 0x235   : > { %v1266_v23 = vpop.eup %1265 }
 0x236   : > { %v485_v24 = vmul.f32 %v1266_v23, %v1696_v44 }
 0x238   : > { %489 = vperm.xlu0 %1241, %v485_v24   ;;  %v932_v24 = vld [vmem:[%s1800_s2] ss:$0 sm:$0xff] }
 0x245   : > { %v543_v25 = vpop.permute.xlu0 %542 }
 0x246   : > { %1267 = vrcp.f32 %v543_v25 }
 0x24a   : > { %v604_v26 = vpop.permute.xlu1 %603 }
 0x24b   : > { %1269 = vrcp.f32 %v604_v26 }
 0x250   : > { %v1268_v27 = vpop.eup %1267 }
 0x251   : > { %v546_v28 = vmul.f32 %v1268_v27, %v1700_v49 }
 0x253   : > { %550 = vperm.xlu1 %1242, %v546_v28  }
 0x255   : > { %v1270_v30 = vpop.eup %1269 }
 0x256   : > { %v607_v31 = vmul.f32 %v1270_v30, %v1704_v54 }
 0x258   : > { %611 = vperm.xlu0 %1241, %v607_v31  }
 0x265   : > { %v665_v32 = vpop.permute.xlu0 %664 }
 0x266   : > { %1271 = vrcp.f32 %v665_v32 }
 0x26a   : > { %v726_v33 = vpop.permute.xlu1 %725 }
 0x26b   : > { %1273 = vrcp.f32 %v726_v33 }
 0x270   : > { %v1272_v35 = vpop.eup %1271 }
 0x271   : > { %v668_v36 = vmul.f32 %v1272_v35, %v1708_v59 }
 0x273   : > { %672 = vperm.xlu1 %1242, %v668_v36  }
 0x275   : > { %v1274_v37 = vpop.eup %1273 }
 0x276   : > { %v729_v38 = vmul.f32 %v1274_v37, %v1712_v2 }
 0x278   : > { %733 = vperm.xlu0 %1241, %v729_v38  }
 0x27c   : > { %1243 = vset.pattern.permute.xlu0 %v1378_v0 }
 0x292   : > { %v307_v41 = vpop.permute.xlu0 %306 }
 0x293   : > { %v309_v46 = vsel %vm303_vm1, %v307_v41, 0.0 }
 0x297   : > { %v368_v40 = vpop.permute.xlu1 %367 }
 0x298   : > { %v370_v47 = vsel %vm364_vm2, %v368_v40, %v309_v46 }
 0x2b2   : > { %v429_v42 = vpop.permute.xlu1 %428 }
 0x2b3   : > { %v431_v48 = vsel %vm425_vm3, %v429_v42, %v370_v47 }
 0x2b7   : > { %v490_v43 = vpop.permute.xlu0 %489 }
 0x2b8   : > { %v492_v50 = vsel %vm486_vm4, %v490_v43, %v431_v48 }
 0x2d2   : > { %v551_v45 = vpop.permute.xlu1 %550 }
 0x2d3   : > { %v553_v52 = vsel %vm547_vm5, %v551_v45, %v492_v50 }
 0x2d7   : > { %v612_v0 = vpop.permute.xlu0 %611 }
 0x2d8   : > { %v614_v53 = vsel %vm608_vm6, %v612_v0, %v553_v52 }
 0x2f2   : > { %v673_v51 = vpop.permute.xlu1 %672 }
 0x2f3   : > { %v675_v55 = vsel %vm669_vm7, %v673_v51, %v614_v53 }
 0x2f7   : > { %v734_v56 = vpop.permute.xlu0 %733 }
 0x2f8   : > { %v736_v57 = vsel %vm730_vm8, %v734_v56, %v675_v55 }
 0x2f9   : > { %v738_v58 = vsel %vm737_vm9, %v736_v57, -inf }
 0x2fa   : > { %739 = vmax.xlane.f32.xlu1 %v738_v58 }
 0x387   : > { %v740_v60 = vpop.xlane.xlu1 %739 }
 0x388   : > { %v741_v61 = vsub.f32 %v736_v57, %v740_v60 }
 0x38a   : > { %v742_v62 = vmul.f32 1.442695, %v741_v61 }
 0x38c   : > { %1275 = vpow2.f32 %v742_v62 }
 0x396   : > { %v1276_v63 = vpop.eup %1275 }
 0x397   : > { %v744_v3 = vsel %vm737_vm9, %v1276_v63, 0.0 }
 0x398   : > { %745 = vadd.xlane.f32.xlu0 %v744_v3 }
 0x425   : > { %v746_v4 = vpop.xlane.xlu0 %745 }
 0x426   : > { %1277 = vrcp.f32 %v746_v4 }
 0x430   : > { %v1278_v5 = vpop.eup %1277 }
 0x431   : > { %v748_v6 = vmul.f32 %v1278_v5, %v1276_v63 }
 0x433   : > { %757 = vperm.xlu1 %1242, %v748_v6   ;;  %751 = vperm.xlu0 %1243, %v748_v6  }
 0x437   : > { %1244 = vset.pattern.permute.xlu1 %v1379_v1  ;;  %1250 = vset.pattern.permute.xlu0 %v1387_v14 }
 0x438   : > { %763 = vperm.xlu1 %1244, %v748_v6  }
 0x43c   : > { %1245 = vset.pattern.permute.xlu1 %v1383_v7 }
 0x43d   : > { %769 = vperm.xlu1 %1245, %v748_v6  }
 0x441   : > { %1246 = vset.pattern.permute.xlu1 %v1384_v9 }
 0x442   : > { %775 = vperm.xlu1 %1246, %v748_v6  }
 0x446   : > { %1247 = vset.pattern.permute.xlu1 %v1385_v10 }
 0x447   : > { %781 = vperm.xlu1 %1247, %v748_v6  }
 0x44b   : > { %1248 = vset.pattern.permute.xlu1 %v1386_v12 }
 0x44c   : > { %787 = vperm.xlu1 %1248, %v748_v6  }
 0x450   : > { %1249 = vset.pattern.permute.xlu1 %v1387_v14 }
 0x451   : > { %793 = vperm.xlu1 %1249, %v748_v6  }
 0x4b2   : > { %v758_v19 = vpop.permute.xlu1 %757  ;;  %v752_v1 = vpop.permute.xlu0 %751 }
 0x4b3   : > { %v760_v8 = vmul.f32 %v758_v19, %v1688_v34  ;;  %v754_v7 = vmul.f32 %v752_v1, %v1684_v29 }
 0x4b5   : > { %v761_v11 = vadd.f32 %v760_v8, %v754_v7 }
 0x4b7   : > { %v764_v13 = vpop.permute.xlu1 %763 }
 0x4b8   : > { %v766_v9 = vmul.f32 %v764_v13, %v1692_v39 }
 0x4ba   : > { %v767_v15 = vadd.f32 %v766_v9, %v761_v11 }
 0x4bc   : > { %v770_v10 = vpop.permute.xlu1 %769 }
 0x4bd   : > { %v772_v16 = vmul.f32 %v770_v10, %v1696_v44 }
 0x4bf   : > { %v773_v12 = vadd.f32 %v772_v16, %v767_v15 }
 0x4c1   : > { %v776_v17 = vpop.permute.xlu1 %775 }
 0x4c2   : > { %v778_v14 = vmul.f32 %v776_v17, %v1700_v49 }
 0x4c4   : > { %v779_v18 = vadd.f32 %v778_v14, %v773_v12 }
 0x4c6   : > { %v782_v20 = vpop.permute.xlu1 %781 }
 0x4c7   : > { %v784_v21 = vmul.f32 %v782_v20, %v1704_v54 }
 0x4c9   : > { %v785_v34 = vadd.f32 %v784_v21, %v779_v18 }
 0x4cb   : > { %v788_v29 = vpop.permute.xlu1 %787 }
 0x4cc   : > { %v790_v22 = vmul.f32 %v788_v29, %v1708_v59 }
 0x4ce   : > { %v791_v39 = vadd.f32 %v790_v22, %v785_v34 }
 0x4d0   : > { %v794_v23 = vpop.permute.xlu1 %793 }
 0x4d1   : > { %v796_v44 = vmul.f32 %v794_v23, %v1712_v2 }
 0x4d3   : > { %v797_v49 = vadd.f32 %v796_v44, %v791_v39 }
 0x4d5   : > { %v805_v54 = vadd.f32 %v932_v24, %v797_v49 }
 0x4d7   : > { %806 = vst [vmem:[%s176_s6] sm:$0xff] %v805_v54 }
 0x4d8   : > { %1320 = shalt.err (!%p1317_p7)
}
 0x4d9   : > { %s1321_s24 = scalar_lea.hbm %s1756_s10, 128  ;;  %s1325_s27 = scalar_lea.hbm %s1801_s3, 256 }
 0x4da   : > { %p1322_p8 = scmp.ne.s32.totalorder %s1756_s10, %s1321_s24  ;;  %p1326_p1 = scmp.lt.u32.totalorder %s1756_s10, %s1801_s3 }
 0x4db   : > { %p1327_p0 = scmp.lt.u32.totalorder %s1325_s27, %s1321_s24  ;;  %p1329_p6 = scmp.lt.u32.totalorder %s1321_s24, %s1756_s10 }
 0x4dc   : > { %p1323_p11 = pnand %p1322_p8, %p1812_p9 }
 0x4dd   : > { %p1328_p5 = por %p1327_p0, %p1326_p1 }
 0x4de   : > { %p1324_p13 = pneg %p1323_p11 }
 0x4df   : > { %p1330_p10 = por %p1329_p6, %p1328_p5 }
 0x4e1   : > { %p1331_p12 = pnand %p1330_p10, %p1324_p13 }
 0x4e3   : > { %1334 = shalt.err (!%p1331_p12)
}
 0x4e4   : > { %1173 = dma.vmem_to_hbm [thread:$0]  (%p1812_p9), %s1758_s7, 128, %s1756_s10, %s808_s11  }
 0x4e5 PF: > { %p1185_p2 = scmp.ge.s32.totalorder %s1373_s15, 2  ;;  %s833_s30 = sand.u32 1, %s1361_s12  }
 0x4e6   : > { %p1813_p3 = scmp.ne.s32.totalorder %s1806_s23, 0  ;;  %s834_s4 = scalar_lea.sflag [#allocation4], %s833_s30 }
 0x4e8   : > { %p1180_p4 = pnand %p1185_p2, %p1813_p3 }
 0x4ea   : > { %1356 = dma.done.wait (!%p1180_p4), %s834_s4, 128  }
 0x4eb   : > { %1358 = vsyncadd (!%p1180_p4), %s834_s4, 4294967168  ;;  %p14_p7 = scmp.ge.s32.totalorder %s1436_s18, 4   ;;  %s1814_s12 = smov %s1365_s13 }
 0x4ec   : > { %s1815_s13 = smov %s1369_s14  ;;  %s1816_s14 = smov %s1447_s21 }
 0x4ed   : > { %s1817_s15 = smov %s1436_s18  ;;  %16 = sbr.rel (!%p14_p7) target bundleno = 4 (0x4), region = 72 }
 0x4f4   :  { %839 = vsyncpa [#allocation3], 1 }
 0x4f5   :  { %841 = vsyncpa [#allocation3 + $0x1], 1 }
 0x4f6   :  { %842 = vsyncpa [#allocation4], 1 }
 0x4f7   :  { %844 = vsyncpa [#allocation4 + $0x1], 1 }

</bundles_post_ra>
